<compile_context>
chip_gen: v6e
topology: v6e:2x2x1
jax: 0.10.0
libtpu: 0.0.40
codegen_flags: <defaults>
</compile_context>

<pallas_src>
import functools
import math

import jax
import jax.numpy as jnp
import numpy as np
from jax import lax
from jax.experimental import pallas as pl
from jax.experimental.pallas import tpu as pltpu


def _round_up(a, b):
    return (a + b - 1) // b * b


def _linear_wn_kernel(x_ref, v_ref, s_ref, b_ref, o_ref, acc_ref, *, activations):
    """One (tm, tn) output tile, accumulated over the K grid axis."""
    k = pl.program_id(2)

    @pl.when(k == 0)
    def _():
        acc_ref[...] = jnp.zeros_like(acc_ref)

    # x tile: (tm, tk), v tile: (tn, tk)  -> contract over K (dim 1 of both),
    # feeding the MXU in the input dtype, accumulating in f32.
    acc_ref[...] += lax.dot_general(
        x_ref[...],
        v_ref[...],
        dimension_numbers=(((1,), (1,)), ((), ())),
        preferred_element_type=jnp.float32,
    )

    @pl.when(k == pl.num_programs(2) - 1)
    def _():
        # Fold the weight-norm scale g/||v|| into the output tile, add bias,
        # apply tanh-GeLU (EUP) once in the epilogue, then store.
        y = acc_ref[...] * s_ref[...] + b_ref[...]
        if activations:
            y = 0.5 * y * (1.0 + jnp.tanh(y * 0.7978845608 * (1.0 + 0.044715 * y * y)))
        o_ref[...] = y.astype(o_ref.dtype)


def linear_weight_norm(x, v, g, b, *, activations=False, tm=256, tn=256, tk=512):
    """x: (..., K); v: (N, K); g: (N, 1); b: (N,). Returns (..., N)."""
    orig_shape = x.shape
    K = orig_shape[-1]
    N, Kv = v.shape
    assert Kv == K

    x2d = x.reshape(-1, K)
    M = x2d.shape[0]

    # Per-output-row weight-norm scale, computed once in f32 (tiny (N,) op
    # relative to the O(M*N*K) matmul).
    v32 = v.astype(jnp.float32)
    scale = g.reshape(N).astype(jnp.float32) / jnp.sqrt(jnp.sum(v32 * v32, axis=1))

    # Clamp tiles to (padded) problem dims; keep (8, 128) alignment.
    tm = min(tm, _round_up(M, 8))
    tn = min(tn, _round_up(N, 128))
    tk = min(tk, _round_up(K, 128))
    Mp = _round_up(M, tm)
    Np = _round_up(N, tn)
    Kp = _round_up(K, tk)

    # Zero-pad only when needed: padded K contributes nothing to the dot;
    # padded N columns get scale=0, bias=0 and are sliced away below.
    xp = x2d if (Mp == M and Kp == K) else jnp.pad(x2d, ((0, Mp - M), (0, Kp - K)))
    vp = v if (Np == N and Kp == K) else jnp.pad(v, ((0, Np - N), (0, Kp - K)))
    sp = (scale if Np == N else jnp.pad(scale, (0, Np - N))).reshape(1, Np)
    b32 = b.reshape(N).astype(jnp.float32)
    bp = (b32 if Np == N else jnp.pad(b32, (0, Np - N))).reshape(1, Np)

    grid = (Mp // tm, Np // tn, Kp // tk)

    cost = pl.CostEstimate(
        flops=2 * Mp * Np * Kp,
        transcendentals=(Mp * Np if activations else 0),
        bytes_accessed=(
            xp.size * xp.dtype.itemsize
            + vp.size * vp.dtype.itemsize
            + Mp * Np * x.dtype.itemsize
        ),
    )

    out = pl.pallas_call(
        functools.partial(_linear_wn_kernel, activations=activations),
        out_shape=jax.ShapeDtypeStruct((Mp, Np), x.dtype),
        grid_spec=pltpu.PrefetchScalarGridSpec(
            num_scalar_prefetch=0,
            grid=grid,
            in_specs=[
                pl.BlockSpec((tm, tk), lambda i, j, k: (i, k)),   # x
                pl.BlockSpec((tn, tk), lambda i, j, k: (j, k)),   # v
                pl.BlockSpec((1, tn), lambda i, j, k: (0, j)),    # scale (k-invariant)
                pl.BlockSpec((1, tn), lambda i, j, k: (0, j)),    # bias  (k-invariant)
            ],
            out_specs=pl.BlockSpec((tm, tn), lambda i, j, k: (i, j)),
            scratch_shapes=[pltpu.VMEM((tm, tn), jnp.float32)],
        ),
        compiler_params=pltpu.CompilerParams(
            dimension_semantics=("parallel", "parallel", "arbitrary"),
        ),
        cost_estimate=cost,
    )(xp, vp, sp, bp)

    if Mp != M or Np != N:
        out = out[:M, :N]
    return out.reshape(*orig_shape[:-1], N)


if __name__ == "__main__":
    # Module config (synthetic, deterministic init mirroring __init__):
    in_features, out_features = 32, 64
    activations = True

    key = jax.random.PRNGKey(0)
    kx, kv = jax.random.split(key)

    # nn.init.normal_(weight, std=sqrt(2/in)) since activations=True
    std = math.sqrt((2.0 if activations else 1.0) / in_features)
    v = jax.random.normal(kv, (out_features, in_features), jnp.float32) * std
    # weight_norm init: g = ||v|| per output row (so initial W == v)
    g = jnp.sqrt(jnp.sum(v * v, axis=1, keepdims=True))          # (N, 1)
    # nn.init.zeros_(bias)
    b = jnp.zeros((out_features,), jnp.float32)

    # Input: (batch=2, seq=8, in_features=32)
    x = jax.random.normal(kx, (2, 8, in_features), jnp.float32)

    y = linear_weight_norm(x, v, g, b, activations=activations)
    y = jax.block_until_ready(y)

    # Pure-JAX reference for sanity.
    w_ref = v * (g / jnp.sqrt(jnp.sum(v * v, axis=1, keepdims=True)))
    y_ref = x @ w_ref.T + b
    y_ref = 0.5 * y_ref * (
        1.0 + jnp.tanh(y_ref * 0.7978845608 * (1.0 + 0.044715 * y_ref * y_ref))
    )
    assert y.shape == (2, 8, out_features)
    np.testing.assert_allclose(np.asarray(y), np.asarray(y_ref), rtol=1e-5, atol=1e-5)

    print("KERNEL_OK")
</pallas_src>

<mosaic_0001>
module attributes {stable_mosaic.version = 11 : i64} {
  func.func @_linear_wn_kernel(%arg0: i32, %arg1: i32, %arg2: i32, %arg3: memref<16x128xf32, #tpu.memory_space<vmem>>, %arg4: memref<128x128xf32, #tpu.memory_space<vmem>>, %arg5: memref<1x128xf32, #tpu.memory_space<vmem>>, %arg6: memref<1x128xf32, #tpu.memory_space<vmem>>, %arg7: memref<16x128xf32, #tpu.memory_space<vmem>>, %arg8: memref<16x128xf32, #tpu.memory_space<vmem>>) attributes {dimension_semantics = [#tpu.dimension_semantics<parallel>, #tpu.dimension_semantics<parallel>, #tpu.dimension_semantics<arbitrary>], iteration_bounds = array<i64: 1, 1, 1>, scalar_prefetch = 0 : i64, scratch_operands = 1 : i64, tpu.core_type = #tpu.core_type<tc>, window_params = [{transform_indices = @transform_0, window_bounds = array<i64: 16, 128>}, {transform_indices = @transform_1, window_bounds = array<i64: 128, 128>}, {transform_indices = @transform_2, window_bounds = array<i64: 1, 128>}, {transform_indices = @transform_3, window_bounds = array<i64: 1, 128>}, {transform_indices = @transform_4, window_bounds = array<i64: 16, 128>}]} {
    %c0_i32 = arith.constant 0 : i32
    %0 = arith.cmpi eq, %arg2, %c0_i32 : i32
    %1 = arith.extui %0 : i1 to i32
    %c0_i32_0 = arith.constant 0 : i32
    %2 = arith.cmpi ne, %1, %c0_i32_0 : i32
    scf.if %2 {
      %cst_10 = arith.constant 0.000000e+00 : f32
      %12 = vector.broadcast %cst_10 : f32 to vector<16x128xf32>
      %c0_11 = arith.constant 0 : index
      %c0_12 = arith.constant 0 : index
      %13 = vector.load %arg8[%c0_11, %c0_12] : memref<16x128xf32, #tpu.memory_space<vmem>>, vector<16x128xf32>
      tpu.vector_store %arg8[%c0_11, %c0_12], %12 {strides = array<i32>} : memref<16x128xf32, #tpu.memory_space<vmem>>, vector<16x128xf32>,
    } else {
    }
    %c0 = arith.constant 0 : index
    %c0_1 = arith.constant 0 : index
    %3 = vector.load %arg8[%c0, %c0_1] : memref<16x128xf32, #tpu.memory_space<vmem>>, vector<16x128xf32>
    %c0_2 = arith.constant 0 : index
    %c0_3 = arith.constant 0 : index
    %4 = vector.load %arg3[%c0_2, %c0_3] : memref<16x128xf32, #tpu.memory_space<vmem>>, vector<16x128xf32>
    %c0_4 = arith.constant 0 : index
    %c0_5 = arith.constant 0 : index
    %5 = vector.load %arg4[%c0_4, %c0_5] : memref<128x128xf32, #tpu.memory_space<vmem>>, vector<128x128xf32>
    %cst = arith.constant dense<0.000000e+00> : vector<16x128xf32>
    %6 = tpu.matmul %4, %5, %cst {dimension_numbers = #tpu.dot_dimension_numbers<[1], [1], [0], [0], [0, 0, 1, 0], [], []>} : vector<16x128xf32>, vector<128x128xf32>, vector<16x128xf32> -> vector<16x128xf32>
    %7 = arith.addf %3, %6 : vector<16x128xf32>
    %c0_6 = arith.constant 0 : index
    %c0_7 = arith.constant 0 : index
    %8 = vector.load %arg8[%c0_6, %c0_7] : memref<16x128xf32, #tpu.memory_space<vmem>>, vector<16x128xf32>
    tpu.vector_store %arg8[%c0_6, %c0_7], %7 {strides = array<i32>} : memref<16x128xf32, #tpu.memory_space<vmem>>, vector<16x128xf32>,
    %c0_i32_8 = arith.constant 0 : i32
    %9 = arith.cmpi eq, %arg2, %c0_i32_8 : i32
    %10 = arith.extui %9 : i1 to i32
    %c0_i32_9 = arith.constant 0 : i32
    %11 = arith.cmpi ne, %10, %c0_i32_9 : i32
    scf.if %11 {
      %c0_10 = arith.constant 0 : index
      %c0_11 = arith.constant 0 : index
      %12 = vector.load %arg8[%c0_10, %c0_11] : memref<16x128xf32, #tpu.memory_space<vmem>>, vector<16x128xf32>
      %c0_12 = arith.constant 0 : index
      %c0_13 = arith.constant 0 : index
      %13 = vector.load %arg5[%c0_12, %c0_13] : memref<1x128xf32, #tpu.memory_space<vmem>>, vector<1x128xf32>
      %14 = vector.broadcast %13 : vector<1x128xf32> to vector<16x128xf32>
      %15 = arith.mulf %12, %14 : vector<16x128xf32>
      %c0_14 = arith.constant 0 : index
      %c0_15 = arith.constant 0 : index
      %16 = vector.load %arg6[%c0_14, %c0_15] : memref<1x128xf32, #tpu.memory_space<vmem>>, vector<1x128xf32>
      %17 = vector.broadcast %16 : vector<1x128xf32> to vector<16x128xf32>
      %18 = arith.addf %15, %17 : vector<16x128xf32>
      %cst_16 = arith.constant 5.000000e-01 : f32
      %19 = vector.broadcast %cst_16 : f32 to vector<16x128xf32>
      %20 = arith.mulf %19, %18 : vector<16x128xf32>
      %cst_17 = arith.constant 0.797884583 : f32
      %21 = vector.broadcast %cst_17 : f32 to vector<16x128xf32>
      %22 = arith.mulf %18, %21 : vector<16x128xf32>
      %cst_18 = arith.constant 4.471500e-02 : f32
      %23 = vector.broadcast %cst_18 : f32 to vector<16x128xf32>
      %24 = arith.mulf %23, %18 : vector<16x128xf32>
      %25 = arith.mulf %24, %18 : vector<16x128xf32>
      %cst_19 = arith.constant 1.000000e+00 : f32
      %26 = vector.broadcast %cst_19 : f32 to vector<16x128xf32>
      %27 = arith.addf %26, %25 : vector<16x128xf32>
      %28 = arith.mulf %22, %27 : vector<16x128xf32>
      %29 = math.tanh %28 : vector<16x128xf32>
      %cst_20 = arith.constant 1.000000e+00 : f32
      %30 = vector.broadcast %cst_20 : f32 to vector<16x128xf32>
      %31 = arith.addf %30, %29 : vector<16x128xf32>
      %32 = arith.mulf %20, %31 : vector<16x128xf32>
      %c0_21 = arith.constant 0 : index
      %c0_22 = arith.constant 0 : index
      %33 = vector.load %arg7[%c0_21, %c0_22] : memref<16x128xf32, #tpu.memory_space<vmem>>, vector<16x128xf32>
      tpu.vector_store %arg7[%c0_21, %c0_22], %32 {strides = array<i32>} : memref<16x128xf32, #tpu.memory_space<vmem>>, vector<16x128xf32>,
    } else {
    }
    return
  }
  func.func @transform_0(%arg0: i32, %arg1: i32, %arg2: i32) -> (i32, i32) {
    %c0_i32 = arith.constant 0 : i32
    return %arg0, %arg2 : i32, i32
  }
  func.func @transform_1(%arg0: i32, %arg1: i32, %arg2: i32) -> (i32, i32) {
    %c0_i32 = arith.constant 0 : i32
    return %arg1, %arg2 : i32, i32
  }
  func.func @transform_2(%arg0: i32, %arg1: i32, %arg2: i32) -> (i32, i32) {
    %c0_i32 = arith.constant 0 : i32
    %c0_i32_0 = arith.constant 0 : i32
    return %c0_i32, %arg1 : i32, i32
  }
  func.func @transform_3(%arg0: i32, %arg1: i32, %arg2: i32) -> (i32, i32) {
    %c0_i32 = arith.constant 0 : i32
    %c0_i32_0 = arith.constant 0 : i32
    return %c0_i32, %arg1 : i32, i32
  }
  func.func @transform_4(%arg0: i32, %arg1: i32, %arg2: i32) -> (i32, i32) {
    %c0_i32 = arith.constant 0 : i32
    return %arg0, %arg1 : i32, i32
  }
}

</mosaic_0001>

<bundles_post_ra>
// kernel: tpu_custom_call.1
= control target key start
LH: loop header
LB: loop body
LE: loop exit
PB: predicated region body
PF: predicated region fallthrough
CT: control target
= control target key end

     0   :  { %9 = vsyncpa [#allocation4], 0  ;;  %s396_s0 = inlined_call_operand.hbm [shape: f32[16,128], index: 0, kind: input, shape index: {}]   ;;  %s397_s1 = inlined_call_operand.hbm [shape: f32[128,128], index: 1, kind: input, shape index: {}]   ;;  %s398_s2 = inlined_call_operand.vmem [shape: f32[1,128], index: 2, kind: input, shape index: {}]   ;;  %s399_s3 = inlined_call_operand.vmem [shape: f32[1,128], index: 3, kind: input, shape index: {}]   ;;  %s400_s4 = inlined_call_operand.hbm [shape: f32[16,128], index: 4, kind: output, shape index: {}]  }
   0x1   :  { %10 = vsyncpa [#allocation7], 0 }
   0x2   :  { %11 = vsyncpa [#allocation5], 0  ;;  %s342_s15 = smov [#allocation3]  }
   0x3   :  { %s17_s16 = sshll.u32 %s342_s15, 4  ;;  %s18_s16 = int_to_ptr.vmem [resolvable:$true] %s17_s16 }
   0x4   :  { %s284_s17 = scalar_lea.vmem %s18_s16, 256  ;;  %p289_p1 = scmp.lt.s32.totalorder %s18_s16, %s18_s16 }
   0x5   :  { %p285_p0 = scmp.ne.s32.totalorder %s18_s16, %s284_s17  ;;  %p290_p2 = scmp.lt.s32.totalorder %s284_s17, %s284_s17 }
   0x7   :  { %p291_p3 = por %p290_p2, %p289_p1 }
   0x9   :  { %p292_p4 = pnand %p291_p3, %p285_p0 }
   0xb   :  { %295 = shalt.err (!%p292_p4)
}
   0xc   :  { %s343_s18 = smov 128   ;;  %s344_s19 = smov 8  }
   0xd   :  { %23 = dma.hbm_to_vmem [thread:$0]  %s396_s0, 256, %s18_s16, [#allocation4], %s343_s18, %s343_s18, %s344_s19  }
   0xe   :  { %s345_s22 = smov [#allocation6]  }
   0xf   :  { %s29_s23 = sshll.u32 %s345_s22, 4  ;;  %s30_s23 = int_to_ptr.vmem [resolvable:$true] %s29_s23 }
  0x10   :  { %s304_s24 = scalar_lea.vmem %s30_s23, 2048  ;;  %p309_p6 = scmp.lt.s32.totalorder %s30_s23, %s30_s23 }
  0x11   :  { %p305_p5 = scmp.ne.s32.totalorder %s30_s23, %s304_s24  ;;  %p310_p7 = scmp.lt.s32.totalorder %s304_s24, %s304_s24 }
  0x13   :  { %p311_p8 = por %p310_p7, %p309_p6 }
  0x15   :  { %p312_p9 = pnand %p311_p8, %p305_p5 }
  0x17   :  { %315 = shalt.err (!%p312_p9)
}
  0x18   :  { %35 = dma.hbm_to_vmem [thread:$0]  %s397_s1, 2048, %s30_s23, [#allocation7], %s343_s18, %s343_s18, %s344_s19  }
  0x19   :  { %336 = dma.done.wait [#allocation4], 256  }
  0x1a   :  { %337 = vsyncadd [#allocation4], 4294967040 }
  0x1b   :  { %338 = dma.done.wait [#allocation7], 2048  }
  0x1c   :  { %339 = vsyncadd [#allocation7], 4294965248  ;;  %v71_v0 = vld [vmem:[#allocation6 + $0x78] sm:$0xff]  ;;  %v70_v1 = vld [vmem:[#allocation6 + $0x70] sm:$0xff] }
  0x1d   :  { %232 = vmatprep.subr.mxu0 %v71_v0  ;;  %v69_v2 = vld [vmem:[#allocation6 + $0x68] sm:$0xff]  ;;  %v54_v3 = vld [vmem:[#allocation3] sm:$0xff]  ;;  %v68_v4 = vld [vmem:[#allocation6 + $0x60] sm:$0xff] }
  0x1e   :  { %233 = vmatpush3.xpose.msra.mxu0 %v71_v0  ;;  %264 = vmatprep.mubr.f32.mxu0 %v54_v3  ;;  %v67_v5 = vld [vmem:[#allocation6 + $0x58] sm:$0xff]  ;;  %v66_v6 = vld [vmem:[#allocation6 + $0x50] sm:$0xff]  ;;  %v65_v7 = vld [vmem:[#allocation6 + $0x48] sm:$0xff] }
  0x1f   :  { %234 = vmatprep.subr.mxu0 %v70_v1  ;;  %v64_v8 = vld [vmem:[#allocation6 + $0x40] sm:$0xff]  ;;  %v63_v9 = vld [vmem:[#allocation6 + $0x38] sm:$0xff]  ;;  %v62_v10 = vld [vmem:[#allocation6 + $0x30] sm:$0xff] }
  0x20   :  { %v61_v11 = vld [vmem:[#allocation6 + $0x28] sm:$0xff]  ;;  %v60_v12 = vld [vmem:[#allocation6 + $0x20] sm:$0xff]  ;;  %v59_v13 = vld [vmem:[#allocation6 + $0x18] sm:$0xff] }
  0x21   :  { %v58_v14 = vld [vmem:[#allocation6 + $0x10] sm:$0xff]  ;;  %v57_v15 = vld [vmem:[#allocation6 + $0x8] sm:$0xff]  ;;  %v56_v16 = vld [vmem:[#allocation6] sm:$0xff] }
  0x22   :  { %235 = vmatpush3.xpose.msra.mxu0 %v70_v1  ;;  %v55_v17 = vld [vmem:[#allocation3 + $0x8] sm:$0xff]  ;;  %v212_v18 = vld [vmem:[%s398_s2] ss:$0 sm:$0xff]  ;;  %s346_s2 = smov [#allocation8]  }
  0x23   :  { %236 = vmatprep.subr.mxu0 %v69_v2  ;;  %v213_v20 = vld [vmem:[%s399_s3] ss:$0 sm:$0xff]  ;;  %s199_s3 = sshll.u32 %s346_s2, 4  ;;  %s200_s3 = int_to_ptr.vmem [resolvable:$true] %s199_s3 }
  0x24   :  { %s316_s29 = scalar_lea.vmem %s200_s3, 256  ;;  %p321_p11 = scmp.lt.s32.totalorder %s200_s3, %s200_s3 }
  0x25   :  { %p317_p10 = scmp.ne.s32.totalorder %s200_s3, %s316_s29  ;;  %p322_p12 = scmp.lt.s32.totalorder %s316_s29, %s316_s29 }
  0x26   :  { %237 = vmatpush3.xpose.msra.mxu0 %v69_v2 }
  0x27   :  { %238 = vmatprep.subr.mxu0 %v68_v4  ;;  %p323_p13 = por %p322_p12, %p321_p11 }
  0x29   :  { %p324_p0 = pnand %p323_p13, %p317_p10 }
  0x2a   :  { %239 = vmatpush3.xpose.msra.mxu0 %v68_v4 }
  0x2b   :  { %240 = vmatprep.subr.mxu0 %v67_v5 }
  0x2e   :  { %241 = vmatpush3.xpose.msra.mxu0 %v67_v5 }
  0x2f   :  { %242 = vmatprep.subr.mxu0 %v66_v6 }
  0x32   :  { %243 = vmatpush3.xpose.msra.mxu0 %v66_v6 }
  0x33   :  { %244 = vmatprep.subr.mxu0 %v65_v7 }
  0x36   :  { %245 = vmatpush3.xpose.msra.mxu0 %v65_v7 }
  0x37   :  { %246 = vmatprep.subr.mxu0 %v64_v8 }
  0x3a   :  { %247 = vmatpush3.xpose.msra.mxu0 %v64_v8 }
  0x3b   :  { %248 = vmatprep.subr.mxu0 %v63_v9 }
  0x3e   :  { %249 = vmatpush3.xpose.msra.mxu0 %v63_v9 }
  0x3f   :  { %250 = vmatprep.subr.mxu0 %v62_v10 }
  0x42   :  { %251 = vmatpush3.xpose.msra.mxu0 %v62_v10 }
  0x43   :  { %252 = vmatprep.subr.mxu0 %v61_v11 }
  0x46   :  { %253 = vmatpush3.xpose.msra.mxu0 %v61_v11 }
  0x47   :  { %254 = vmatprep.subr.mxu0 %v60_v12 }
  0x4a   :  { %255 = vmatpush3.xpose.msra.mxu0 %v60_v12 }
  0x4b   :  { %256 = vmatprep.subr.mxu0 %v59_v13 }
  0x4e   :  { %257 = vmatpush3.xpose.msra.mxu0 %v59_v13 }
  0x4f   :  { %258 = vmatprep.subr.mxu0 %v58_v14 }
  0x52   :  { %259 = vmatpush3.xpose.msra.mxu0 %v58_v14 }
  0x53   :  { %260 = vmatprep.subr.mxu0 %v57_v15 }
  0x56   :  { %261 = vmatpush3.xpose.msra.mxu0 %v57_v15 }
  0x57   :  { %262 = vmatprep.subr.mxu0 %v56_v16 }
  0x5a   :  { %263 = vmatpush3.xpose.msra.mxu0 %v56_v16 }
  0x5d   :  { %265 = vmatmul.mubr.f32.vlgmr.msra.gmra.mxu0 %v55_v17 }
 0x11d   :  { %v266_v19 = vpop.f32.mrf.mxu0 }
 0x11e   :  { %v164_v21 = vmul.f32 %v266_v19, %v212_v18 }
 0x11f   :  { %v138_v22 = vpop.f32.mrf.mxu0 }
 0x120   :  { %v173_v23 = vadd.f32 %v213_v20, %v164_v21  ;;  %v163_v24 = vmul.f32 %v212_v18, %v138_v22 }
 0x122   :  { %v179_v25 = vmul.f32 0.044715, %v173_v23  ;;  %v172_v26 = vadd.f32 %v213_v20, %v163_v24  ;;  %v177_v29 = vmul.f32 0.7978846, %v173_v23  ;;  %v175_v37 = vmul.f32 0.5, %v173_v23 }
 0x124   :  { %v181_v27 = vmul.f32 %v179_v25, %v173_v23  ;;  %v178_v28 = vmul.f32 0.044715, %v172_v26  ;;  %v176_v32 = vmul.f32 0.7978846, %v172_v26  ;;  %v174_v40 = vmul.f32 0.5, %v172_v26 }
 0x126   :  { %v183_v30 = vadd.f32 1.0, %v181_v27  ;;  %v180_v31 = vmul.f32 %v178_v28, %v172_v26 }
 0x128   :  { %v182_v33 = vadd.f32 1.0, %v180_v31  ;;  %v185_v34 = vmul.f32 %v183_v30, %v177_v29 }
 0x12a   :  { %v184_v35 = vmul.f32 %v182_v33, %v176_v32  ;;  %272 = vtanh.f32 %v185_v34 }
 0x12c   :  { %274 = vtanh.f32 %v184_v35 }
 0x137   :  { %v273_v36 = vpop.eup %272 }
 0x138   :  { %v189_v38 = vadd.f32 1.0, %v273_v36 }
 0x139   :  { %v275_v39 = vpop.eup %274 }
 0x13a   :  { %v188_v41 = vadd.f32 1.0, %v275_v39  ;;  %v191_v42 = vmul.f32 %v189_v38, %v175_v37 }
 0x13c   :  { %v190_v43 = vmul.f32 %v188_v41, %v174_v40  ;;  %193 = vst [vmem:[#allocation8 + $0x8] sm:$0xff] %v191_v42 }
 0x13e   :  { %192 = vst [vmem:[#allocation8] sm:$0xff] %v190_v43 }
 0x13f   :  { %327 = shalt.err (!%p324_p0)
}
 0x140   :  { %205 = dma.vmem_to_hbm [thread:$0]  %s200_s3, 256, %s400_s4, [#allocation5], %s343_s18, %s343_s18, %s344_s19  }
 0x141   :  { %340 = dma.done.wait [#allocation5], 256  }
 0x142   :  { %341 = vsyncadd [#allocation5], 4294967040 }
 0x143   :  { %209 = vsyncpa [#allocation4], 1 }
 0x144   :  { %210 = vsyncpa [#allocation7], 1 }
 0x145   :  { %211 = vsyncpa [#allocation5], 1 }

</bundles_post_ra>
